<compile_context>
chip_gen: v5e
topology: v5e:2x2
jax: 0.10.0
libtpu: 0.0.40
codegen_flags: <defaults>
</compile_context>

<pallas_src>
import functools

import jax
import jax.numpy as jnp
import numpy as np
from jax.experimental import pallas as pl
from jax.experimental.pallas import tpu as pltpu

KERNEL_SIZE = 4      # module arg kernel_size
DILATION = 1         # module arg dilation
EPS = 1e-8           # LayerNorm eps in the module


def _residual_block_kernel(x_ref, w1_ref, b1_ref, g1_ref, be1_ref,
                           w2_ref, b2_ref, g2_ref, be2_ref, o_ref,
                           *, L, kernel_size, dilation):
    K = kernel_size
    R = x_ref.shape[0]          # Bt * L rows (Bt sequences stacked along sublanes)
    x = x_ref[...].astype(jnp.float32)                       # (R, C)

    # Per-sequence local timestep index: rows [b*L, (b+1)*L) belong to sequence b.
    t_local = jax.lax.broadcasted_iota(jnp.int32, (R, 1), 0) % L

    def causal_im2col(v, dil):
        """Build (R, K*C) im2col: tap j holds v shifted down by (K-1-j)*dil rows,
        with the first shift rows of every sequence zeroed (causal left pad)."""
        taps = []
        for j in range(K):
            s = (K - 1 - j) * dil
            if s == 0:
                taps.append(v)
                continue
            shifted = pltpu.roll(v, shift=s % R, axis=0) if (s % R) else v
            taps.append(jnp.where(t_local < s, 0.0, shifted))
        return jnp.concatenate(taps, axis=-1)                 # (R, K*C)

    def conv_ln_relu(v, dil, w_ref, b_ref, g_ref, be_ref):
        # One fused MXU matmul per stage: bf16 operands, f32 accumulation.
        im2col = causal_im2col(v, dil).astype(jnp.bfloat16)   # (R, K*C) bf16
        acc = jnp.dot(im2col, w_ref[...],                     # (K*C, C) bf16
                      preferred_element_type=jnp.float32)
        acc = acc + b_ref[...].astype(jnp.float32)
        # LayerNorm over channel dim (f32) + ReLU (dropout p=0 is identity).
        mu = jnp.mean(acc, axis=-1, keepdims=True)
        var = jnp.mean(jnp.square(acc - mu), axis=-1, keepdims=True)
        y = (acc - mu) * jax.lax.rsqrt(var + EPS)
        y = y * g_ref[...].astype(jnp.float32) + be_ref[...].astype(jnp.float32)
        return jnp.maximum(y, 0.0)

    out1 = conv_ln_relu(x, dilation, w1_ref, b1_ref, g1_ref, be1_ref)
    out2 = conv_ln_relu(out1, 2 * dilation, w2_ref, b2_ref, g2_ref, be2_ref)

    # Residual add (enable_res_parameter=False -> no `a` scaling).
    o_ref[...] = (out2 + x).astype(o_ref.dtype)


def _choose_bt(B, L, C, block_bytes):
    """Largest divisor Bt of B s.t. the (Bt*L, C) f32 block fits the byte cap,
    Bt*L is sublane aligned, and (when B allows) the grid keeps >= 2 steps so
    both v7x TensorCores get work."""
    best = 1
    for bt in range(1, B + 1):
        if B % bt:
            continue
        if bt * L * C * 4 > block_bytes:
            break
        if B >= 2 and (B // bt) < 2:
            continue
        if (bt * L) % 8 == 0 or bt == B:
            best = bt
    return best


def residual_block_b(x, params, kernel_size=KERNEL_SIZE, dilation=DILATION,
                     block_bytes=1 << 20):
    """x: (B, L, C) float32. params: (w1, b1, g1, be1, w2, b2, g2, be2).
    w*: (K, Cin, Cout) where w[k, i, o] == torch_conv_weight[o, i, 0, k]."""
    B, L, C_in = x.shape
    w1, b1, g1, be1, w2, b2, g2, be2 = params
    K = kernel_size
    C_out = w1.shape[2]
    assert C_in == C_out, "residual add requires in_channel == out_channel"
    C = C_out

    # Fused tap weights: (K, Cin, Cout) -> (K*Cin, Cout), bf16 MXU operands.
    w1f = w1.reshape(K * C_in, C_out).astype(jnp.bfloat16)
    w2f = w2.reshape(K * C_out, C_out).astype(jnp.bfloat16)
    b1_ = b1.reshape(1, C).astype(jnp.float32)
    g1_ = g1.reshape(1, C).astype(jnp.float32)
    be1_ = be1.reshape(1, C).astype(jnp.float32)
    b2_ = b2.reshape(1, C).astype(jnp.float32)
    g2_ = g2.reshape(1, C).astype(jnp.float32)
    be2_ = be2.reshape(1, C).astype(jnp.float32)

    Bt = _choose_bt(B, L, C, block_bytes)
    R = Bt * L
    assert (R % 8 == 0) or (Bt == B), "Bt*L must be sublane-aligned"

    # Free, contiguous view: sequences stacked along the row (sublane) axis.
    x2 = x.reshape(B * L, C)

    vec_spec = pl.BlockSpec((1, C), lambda i: (0, 0))
    kern = functools.partial(_residual_block_kernel,
                             L=L, kernel_size=K, dilation=dilation)
    out = pl.pallas_call(
        kern,
        out_shape=jax.ShapeDtypeStruct((B * L, C), x.dtype),
        grid_spec=pltpu.PrefetchScalarGridSpec(
            num_scalar_prefetch=0,
            grid=(B // Bt,),
            in_specs=[
                pl.BlockSpec((R, C), lambda i: (i, 0)),                 # x (single stream)
                pl.BlockSpec((K * C_in, C_out), lambda i: (0, 0)),      # W1 fused (bf16)
                vec_spec, vec_spec, vec_spec,                           # b1, gamma1, beta1
                pl.BlockSpec((K * C_out, C_out), lambda i: (0, 0)),     # W2 fused (bf16)
                vec_spec, vec_spec, vec_spec,                           # b2, gamma2, beta2
            ],
            out_specs=pl.BlockSpec((R, C), lambda i: (i, 0)),
        ),
        compiler_params=pltpu.CompilerParams(
            dimension_semantics=("parallel",),
            vmem_limit_bytes=32 * 1024 * 1024),
    )(x2, w1f, b1_, g1_, be1_, w2f, b2_, g2_, be2_)
    return out.reshape(B, L, C)


def reference_forward(x, params, kernel_size=KERNEL_SIZE, dilation=DILATION):
    """Pure-JAX reference mirroring the PyTorch module (NCHW conv path, f32)."""
    w1, b1, g1, be1, w2, b2, g2, be2 = params
    K = kernel_size

    def conv_stage(inp, w_kio, bias, dil):
        w_oihw = jnp.transpose(w_kio, (2, 1, 0))[:, :, None, :]      # (Cout, Cin, 1, K)
        pad = (K - 1) * dil
        xp = jnp.transpose(inp, (0, 2, 1))[:, :, None, :]            # (B, Cin, 1, L)
        xp = jnp.pad(xp, ((0, 0), (0, 0), (0, 0), (pad, 0)))
        y = jax.lax.conv_general_dilated(
            xp, w_oihw, window_strides=(1, 1), padding='VALID',
            rhs_dilation=(1, dil),
            dimension_numbers=('NCHW', 'OIHW', 'NCHW'),
            precision=jax.lax.Precision.HIGHEST)
        y = y + bias[None, :, None, None]
        return jnp.transpose(y[:, :, 0, :], (0, 2, 1))               # (B, L, Cout)

    def ln(y, g, bta):
        mu = y.mean(-1, keepdims=True)
        var = ((y - mu) ** 2).mean(-1, keepdims=True)
        return (y - mu) / jnp.sqrt(var + EPS) * g + bta

    o1 = jax.nn.relu(ln(conv_stage(x, w1, b1, dilation), g1, be1))
    o2 = jax.nn.relu(ln(conv_stage(o1, w2, b2, dilation * 2), g2, be2))
    return o2 + x


if __name__ == "__main__":
    B, L, C = 2, 32, 32
    K, d = KERNEL_SIZE, DILATION

    key = jax.random.PRNGKey(0)
    k0, k1, k2, k3, k4 = jax.random.split(key, 5)
    x = jax.random.normal(k0, (B, L, C), dtype=jnp.float32)

    # Deterministic synthetic parameters (conv weights + biases; LayerNorm defaults).
    w1 = 0.05 * jax.random.normal(k1, (K, C, C), dtype=jnp.float32)
    b1 = 0.05 * jax.random.normal(k2, (C,), dtype=jnp.float32)
    w2 = 0.05 * jax.random.normal(k3, (K, C, C), dtype=jnp.float32)
    b2 = 0.05 * jax.random.normal(k4, (C,), dtype=jnp.float32)
    g1 = jnp.ones((C,), jnp.float32); be1 = jnp.zeros((C,), jnp.float32)
    g2 = jnp.ones((C,), jnp.float32); be2 = jnp.zeros((C,), jnp.float32)
    # TODO(synk): nn.Parameter `a` is unused since enable_res_parameter=False.
    params = (w1, b1, g1, be1, w2, b2, g2, be2)

    out = jax.block_until_ready(residual_block_b(x, params))
    ref = reference_forward(x, params)

    # Numeric contract: bf16 MXU operands with f32 accumulation vs. an f32
    # Precision.HIGHEST reference -> expect O(1e-2) absolute deviation.
    err = float(np.max(np.abs(np.asarray(out) - np.asarray(ref))))
    if not np.allclose(np.asarray(out), np.asarray(ref), rtol=3e-2, atol=3e-2):
        raise AssertionError(f"Pallas kernel mismatch vs reference (max abs err {err})")
    print("KERNEL_OK")
</pallas_src>

<mosaic_0001>
module attributes {stable_mosaic.version = 11 : i64} {
  func.func @_residual_block_kernel(%arg0: i32, %arg1: memref<32x32xf32, #tpu.memory_space<vmem>>, %arg2: memref<128x32xbf16, #tpu.memory_space<vmem>>, %arg3: memref<1x32xf32, #tpu.memory_space<vmem>>, %arg4: memref<1x32xf32, #tpu.memory_space<vmem>>, %arg5: memref<1x32xf32, #tpu.memory_space<vmem>>, %arg6: memref<128x32xbf16, #tpu.memory_space<vmem>>, %arg7: memref<1x32xf32, #tpu.memory_space<vmem>>, %arg8: memref<1x32xf32, #tpu.memory_space<vmem>>, %arg9: memref<1x32xf32, #tpu.memory_space<vmem>>, %arg10: memref<32x32xf32, #tpu.memory_space<vmem>>) attributes {dimension_semantics = [#tpu.dimension_semantics<parallel>], iteration_bounds = array<i64: 2>, scalar_prefetch = 0 : i64, scratch_operands = 0 : i64, tpu.core_type = #tpu.core_type<tc>, window_params = [{transform_indices = @transform_0, window_bounds = array<i64: 32, 32>}, {pipeline_mode = #tpu.pipeline_mode<synchronous>, transform_indices = @transform_1, window_bounds = array<i64: 128, 32>}, {pipeline_mode = #tpu.pipeline_mode<synchronous>, transform_indices = @transform_2, window_bounds = array<i64: 1, 32>}, {pipeline_mode = #tpu.pipeline_mode<synchronous>, transform_indices = @transform_3, window_bounds = array<i64: 1, 32>}, {pipeline_mode = #tpu.pipeline_mode<synchronous>, transform_indices = @transform_4, window_bounds = array<i64: 1, 32>}, {pipeline_mode = #tpu.pipeline_mode<synchronous>, transform_indices = @transform_5, window_bounds = array<i64: 128, 32>}, {pipeline_mode = #tpu.pipeline_mode<synchronous>, transform_indices = @transform_6, window_bounds = array<i64: 1, 32>}, {pipeline_mode = #tpu.pipeline_mode<synchronous>, transform_indices = @transform_7, window_bounds = array<i64: 1, 32>}, {pipeline_mode = #tpu.pipeline_mode<synchronous>, transform_indices = @transform_8, window_bounds = array<i64: 1, 32>}, {transform_indices = @transform_9, window_bounds = array<i64: 32, 32>}]} {
    %c0 = arith.constant 0 : index
    %c0_0 = arith.constant 0 : index
    %0 = vector.load %arg1[%c0, %c0_0] : memref<32x32xf32, #tpu.memory_space<vmem>>, vector<32x32xf32>
    %1 = tpu.iota {dimensions = array<i32: 0>} : vector<32x1xi32>
    %c32_i32 = arith.constant 32 : i32
    %c0_i32 = arith.constant 0 : i32
    %2 = arith.cmpi eq, %c32_i32, %c0_i32 : i32
    %c1_i32 = arith.constant 1 : i32
    %3 = arith.select %2, %c1_i32, %c32_i32 : i32
    %4 = vector.broadcast %3 : i32 to vector<32x1xi32>
    %5 = arith.remsi %1, %4 : vector<32x1xi32>
    %c0_i32_1 = arith.constant 0 : i32
    %6 = vector.broadcast %c0_i32_1 : i32 to vector<32x1xi32>
    %7 = arith.cmpi ne, %5, %6 : vector<32x1xi32>
    %c0_i32_2 = arith.constant 0 : i32
    %8 = vector.broadcast %c0_i32_2 : i32 to vector<32x1xi32>
    %9 = arith.cmpi slt, %5, %8 : vector<32x1xi32>
    %c0_i32_3 = arith.constant 0 : i32
    %10 = arith.cmpi slt, %3, %c0_i32_3 : i32
    %11 = vector.broadcast %10 : i1 to vector<32x1xi1>
    %12 = vector.broadcast %11 : vector<32x1xi1> to vector<32x1xi1>
    %13 = arith.xori %9, %12 : vector<32x1xi1>
    %14 = arith.andi %13, %7 : vector<32x1xi1>
    %15 = vector.broadcast %3 : i32 to vector<32x1xi32>
    %16 = arith.addi %5, %15 : vector<32x1xi32>
    %17 = arith.select %14, %16, %5 : vector<32x1xi1>, vector<32x1xi32>
    %c3_i32 = arith.constant 3 : i32
    %18 = tpu.dynamic_rotate %0 by %c3_i32 dim 0 : vector<32x32xf32>, i32 -> vector<32x32xf32>
    %c3_i32_4 = arith.constant 3 : i32
    %19 = vector.broadcast %c3_i32_4 : i32 to vector<32x1xi32>
    %20 = arith.cmpi slt, %17, %19 : vector<32x1xi32>
    %cst = arith.constant 0.000000e+00 : f32
    %21 = vector.shape_cast %20 : vector<32x1xi1> to vector<32x1xi1>
    %22 = vector.broadcast %21 : vector<32x1xi1> to vector<32x32xi1>
    %23 = vector.broadcast %cst : f32 to vector<32x32xf32>
    %24 = arith.select %22, %23, %18 : vector<32x32xi1>, vector<32x32xf32>
    %c2_i32 = arith.constant 2 : i32
    %25 = tpu.dynamic_rotate %0 by %c2_i32 dim 0 : vector<32x32xf32>, i32 -> vector<32x32xf32>
    %c2_i32_5 = arith.constant 2 : i32
    %26 = vector.broadcast %c2_i32_5 : i32 to vector<32x1xi32>
    %27 = arith.cmpi slt, %17, %26 : vector<32x1xi32>
    %cst_6 = arith.constant 0.000000e+00 : f32
    %28 = vector.shape_cast %27 : vector<32x1xi1> to vector<32x1xi1>
    %29 = vector.broadcast %28 : vector<32x1xi1> to vector<32x32xi1>
    %30 = vector.broadcast %cst_6 : f32 to vector<32x32xf32>
    %31 = arith.select %29, %30, %25 : vector<32x32xi1>, vector<32x32xf32>
    %c1_i32_7 = arith.constant 1 : i32
    %32 = tpu.dynamic_rotate %0 by %c1_i32_7 dim 0 : vector<32x32xf32>, i32 -> vector<32x32xf32>
    %c1_i32_8 = arith.constant 1 : i32
    %33 = vector.broadcast %c1_i32_8 : i32 to vector<32x1xi32>
    %34 = arith.cmpi slt, %17, %33 : vector<32x1xi32>
    %cst_9 = arith.constant 0.000000e+00 : f32
    %35 = vector.shape_cast %34 : vector<32x1xi1> to vector<32x1xi1>
    %36 = vector.broadcast %35 : vector<32x1xi1> to vector<32x32xi1>
    %37 = vector.broadcast %cst_9 : f32 to vector<32x32xf32>
    %38 = arith.select %36, %37, %32 : vector<32x32xi1>, vector<32x32xf32>
    %39 = tpu.concatenate %24, %31, %38, %0 in 1 : vector<32x32xf32>, vector<32x32xf32>, vector<32x32xf32>, vector<32x32xf32> -> vector<32x128xf32>
    %40 = arith.truncf %39 : vector<32x128xf32> to vector<32x128xbf16>
    %c0_10 = arith.constant 0 : index
    %c0_11 = arith.constant 0 : index
    %41 = vector.load %arg2[%c0_10, %c0_11] : memref<128x32xbf16, #tpu.memory_space<vmem>>, vector<128x32xbf16>
    %cst_12 = arith.constant dense<0.000000e+00> : vector<32x32xf32>
    %42 = tpu.matmul %40, %41, %cst_12 {dimension_numbers = #tpu.dot_dimension_numbers<[1], [0], [0], [1], [0, 0, 1, 1], [], []>} : vector<32x128xbf16>, vector<128x32xbf16>, vector<32x32xf32> -> vector<32x32xf32>
    %c0_13 = arith.constant 0 : index
    %c0_14 = arith.constant 0 : index
    %43 = vector.load %arg3[%c0_13, %c0_14] : memref<1x32xf32, #tpu.memory_space<vmem>>, vector<1x32xf32>
    %44 = vector.broadcast %43 : vector<1x32xf32> to vector<32x32xf32>
    %45 = arith.addf %42, %44 : vector<32x32xf32>
    %cst_15 = arith.constant dense<0.000000e+00> : vector<32xf32>
    %46 = vector.multi_reduction <add>, %45, %cst_15 [1] : vector<32x32xf32> to vector<32xf32>
    %47 = vector.shape_cast %46 : vector<32xf32> to vector<32x1xf32>
    %cst_16 = arith.constant 3.200000e+01 : f32
    %48 = vector.broadcast %cst_16 : f32 to vector<32x1xf32>
    %49 = arith.divf %47, %48 : vector<32x1xf32>
    %50 = vector.broadcast %49 : vector<32x1xf32> to vector<32x32xf32>
    %51 = arith.subf %45, %50 : vector<32x32xf32>
    %52 = arith.mulf %51, %51 : vector<32x32xf32>
    %cst_17 = arith.constant dense<0.000000e+00> : vector<32xf32>
    %53 = vector.multi_reduction <add>, %52, %cst_17 [1] : vector<32x32xf32> to vector<32xf32>
    %54 = vector.shape_cast %53 : vector<32xf32> to vector<32x1xf32>
    %cst_18 = arith.constant 3.200000e+01 : f32
    %55 = vector.broadcast %cst_18 : f32 to vector<32x1xf32>
    %56 = arith.divf %54, %55 : vector<32x1xf32>
    %57 = vector.broadcast %49 : vector<32x1xf32> to vector<32x32xf32>
    %58 = arith.subf %45, %57 : vector<32x32xf32>
    %cst_19 = arith.constant 9.99999993E-9 : f32
    %59 = vector.broadcast %cst_19 : f32 to vector<32x1xf32>
    %60 = arith.addf %56, %59 : vector<32x1xf32>
    %61 = math.rsqrt %60 : vector<32x1xf32>
    %62 = vector.broadcast %61 : vector<32x1xf32> to vector<32x32xf32>
    %63 = arith.mulf %58, %62 : vector<32x32xf32>
    %c0_20 = arith.constant 0 : index
    %c0_21 = arith.constant 0 : index
    %64 = vector.load %arg4[%c0_20, %c0_21] : memref<1x32xf32, #tpu.memory_space<vmem>>, vector<1x32xf32>
    %65 = vector.broadcast %64 : vector<1x32xf32> to vector<32x32xf32>
    %66 = arith.mulf %63, %65 : vector<32x32xf32>
    %c0_22 = arith.constant 0 : index
    %c0_23 = arith.constant 0 : index
    %67 = vector.load %arg5[%c0_22, %c0_23] : memref<1x32xf32, #tpu.memory_space<vmem>>, vector<1x32xf32>
    %68 = vector.broadcast %67 : vector<1x32xf32> to vector<32x32xf32>
    %69 = arith.addf %66, %68 : vector<32x32xf32>
    %cst_24 = arith.constant 0.000000e+00 : f32
    %70 = vector.broadcast %cst_24 : f32 to vector<32x32xf32>
    %71 = arith.maximumf %69, %70 : vector<32x32xf32>
    %c6_i32 = arith.constant 6 : i32
    %72 = tpu.dynamic_rotate %71 by %c6_i32 dim 0 : vector<32x32xf32>, i32 -> vector<32x32xf32>
    %c6_i32_25 = arith.constant 6 : i32
    %73 = vector.broadcast %c6_i32_25 : i32 to vector<32x1xi32>
    %74 = arith.cmpi slt, %17, %73 : vector<32x1xi32>
    %cst_26 = arith.constant 0.000000e+00 : f32
    %75 = vector.shape_cast %74 : vector<32x1xi1> to vector<32x1xi1>
    %76 = vector.broadcast %75 : vector<32x1xi1> to vector<32x32xi1>
    %77 = vector.broadcast %cst_26 : f32 to vector<32x32xf32>
    %78 = arith.select %76, %77, %72 : vector<32x32xi1>, vector<32x32xf32>
    %c4_i32 = arith.constant 4 : i32
    %79 = tpu.dynamic_rotate %71 by %c4_i32 dim 0 : vector<32x32xf32>, i32 -> vector<32x32xf32>
    %c4_i32_27 = arith.constant 4 : i32
    %80 = vector.broadcast %c4_i32_27 : i32 to vector<32x1xi32>
    %81 = arith.cmpi slt, %17, %80 : vector<32x1xi32>
    %cst_28 = arith.constant 0.000000e+00 : f32
    %82 = vector.shape_cast %81 : vector<32x1xi1> to vector<32x1xi1>
    %83 = vector.broadcast %82 : vector<32x1xi1> to vector<32x32xi1>
    %84 = vector.broadcast %cst_28 : f32 to vector<32x32xf32>
    %85 = arith.select %83, %84, %79 : vector<32x32xi1>, vector<32x32xf32>
    %c2_i32_29 = arith.constant 2 : i32
    %86 = tpu.dynamic_rotate %71 by %c2_i32_29 dim 0 : vector<32x32xf32>, i32 -> vector<32x32xf32>
    %c2_i32_30 = arith.constant 2 : i32
    %87 = vector.broadcast %c2_i32_30 : i32 to vector<32x1xi32>
    %88 = arith.cmpi slt, %17, %87 : vector<32x1xi32>
    %cst_31 = arith.constant 0.000000e+00 : f32
    %89 = vector.shape_cast %88 : vector<32x1xi1> to vector<32x1xi1>
    %90 = vector.broadcast %89 : vector<32x1xi1> to vector<32x32xi1>
    %91 = vector.broadcast %cst_31 : f32 to vector<32x32xf32>
    %92 = arith.select %90, %91, %86 : vector<32x32xi1>, vector<32x32xf32>
    %93 = tpu.concatenate %78, %85, %92, %71 in 1 : vector<32x32xf32>, vector<32x32xf32>, vector<32x32xf32>, vector<32x32xf32> -> vector<32x128xf32>
    %94 = arith.truncf %93 : vector<32x128xf32> to vector<32x128xbf16>
    %c0_32 = arith.constant 0 : index
    %c0_33 = arith.constant 0 : index
    %95 = vector.load %arg6[%c0_32, %c0_33] : memref<128x32xbf16, #tpu.memory_space<vmem>>, vector<128x32xbf16>
    %cst_34 = arith.constant dense<0.000000e+00> : vector<32x32xf32>
    %96 = tpu.matmul %94, %95, %cst_34 {dimension_numbers = #tpu.dot_dimension_numbers<[1], [0], [0], [1], [0, 0, 1, 1], [], []>} : vector<32x128xbf16>, vector<128x32xbf16>, vector<32x32xf32> -> vector<32x32xf32>
    %c0_35 = arith.constant 0 : index
    %c0_36 = arith.constant 0 : index
    %97 = vector.load %arg7[%c0_35, %c0_36] : memref<1x32xf32, #tpu.memory_space<vmem>>, vector<1x32xf32>
    %98 = vector.broadcast %97 : vector<1x32xf32> to vector<32x32xf32>
    %99 = arith.addf %96, %98 : vector<32x32xf32>
    %cst_37 = arith.constant dense<0.000000e+00> : vector<32xf32>
    %100 = vector.multi_reduction <add>, %99, %cst_37 [1] : vector<32x32xf32> to vector<32xf32>
    %101 = vector.shape_cast %100 : vector<32xf32> to vector<32x1xf32>
    %cst_38 = arith.constant 3.200000e+01 : f32
    %102 = vector.broadcast %cst_38 : f32 to vector<32x1xf32>
    %103 = arith.divf %101, %102 : vector<32x1xf32>
    %104 = vector.broadcast %103 : vector<32x1xf32> to vector<32x32xf32>
    %105 = arith.subf %99, %104 : vector<32x32xf32>
    %106 = arith.mulf %105, %105 : vector<32x32xf32>
    %cst_39 = arith.constant dense<0.000000e+00> : vector<32xf32>
    %107 = vector.multi_reduction <add>, %106, %cst_39 [1] : vector<32x32xf32> to vector<32xf32>
    %108 = vector.shape_cast %107 : vector<32xf32> to vector<32x1xf32>
    %cst_40 = arith.constant 3.200000e+01 : f32
    %109 = vector.broadcast %cst_40 : f32 to vector<32x1xf32>
    %110 = arith.divf %108, %109 : vector<32x1xf32>
    %111 = vector.broadcast %103 : vector<32x1xf32> to vector<32x32xf32>
    %112 = arith.subf %99, %111 : vector<32x32xf32>
    %cst_41 = arith.constant 9.99999993E-9 : f32
    %113 = vector.broadcast %cst_41 : f32 to vector<32x1xf32>
    %114 = arith.addf %110, %113 : vector<32x1xf32>
    %115 = math.rsqrt %114 : vector<32x1xf32>
    %116 = vector.broadcast %115 : vector<32x1xf32> to vector<32x32xf32>
    %117 = arith.mulf %112, %116 : vector<32x32xf32>
    %c0_42 = arith.constant 0 : index
    %c0_43 = arith.constant 0 : index
    %118 = vector.load %arg8[%c0_42, %c0_43] : memref<1x32xf32, #tpu.memory_space<vmem>>, vector<1x32xf32>
    %119 = vector.broadcast %118 : vector<1x32xf32> to vector<32x32xf32>
    %120 = arith.mulf %117, %119 : vector<32x32xf32>
    %c0_44 = arith.constant 0 : index
    %c0_45 = arith.constant 0 : index
    %121 = vector.load %arg9[%c0_44, %c0_45] : memref<1x32xf32, #tpu.memory_space<vmem>>, vector<1x32xf32>
    %122 = vector.broadcast %121 : vector<1x32xf32> to vector<32x32xf32>
    %123 = arith.addf %120, %122 : vector<32x32xf32>
    %cst_46 = arith.constant 0.000000e+00 : f32
    %124 = vector.broadcast %cst_46 : f32 to vector<32x32xf32>
    %125 = arith.maximumf %123, %124 : vector<32x32xf32>
    %126 = arith.addf %125, %0 : vector<32x32xf32>
    %c0_47 = arith.constant 0 : index
    %c0_48 = arith.constant 0 : index
    %127 = vector.load %arg10[%c0_47, %c0_48] : memref<32x32xf32, #tpu.memory_space<vmem>>, vector<32x32xf32>
    tpu.vector_store %arg10[%c0_47, %c0_48], %126 {strides = array<i32>} : memref<32x32xf32, #tpu.memory_space<vmem>>, vector<32x32xf32>,
    return
  }
  func.func @transform_0(%arg0: i32) -> (i32, i32) {
    %c0_i32 = arith.constant 0 : i32
    %c0_i32_0 = arith.constant 0 : i32
    return %arg0, %c0_i32 : i32, i32
  }
  func.func @transform_1(%arg0: i32) -> (i32, i32) {
    %c0_i32 = arith.constant 0 : i32
    %c0_i32_0 = arith.constant 0 : i32
    %c0_i32_1 = arith.constant 0 : i32
    return %c0_i32, %c0_i32_0 : i32, i32
  }
  func.func @transform_2(%arg0: i32) -> (i32, i32) {
    %c0_i32 = arith.constant 0 : i32
    %c0_i32_0 = arith.constant 0 : i32
    %c0_i32_1 = arith.constant 0 : i32
    return %c0_i32, %c0_i32_0 : i32, i32
  }
  func.func @transform_3(%arg0: i32) -> (i32, i32) {
    %c0_i32 = arith.constant 0 : i32
    %c0_i32_0 = arith.constant 0 : i32
    %c0_i32_1 = arith.constant 0 : i32
    return %c0_i32, %c0_i32_0 : i32, i32
  }
  func.func @transform_4(%arg0: i32) -> (i32, i32) {
    %c0_i32 = arith.constant 0 : i32
    %c0_i32_0 = arith.constant 0 : i32
    %c0_i32_1 = arith.constant 0 : i32
    return %c0_i32, %c0_i32_0 : i32, i32
  }
  func.func @transform_5(%arg0: i32) -> (i32, i32) {
    %c0_i32 = arith.constant 0 : i32
    %c0_i32_0 = arith.constant 0 : i32
    %c0_i32_1 = arith.constant 0 : i32
    return %c0_i32, %c0_i32_0 : i32, i32
  }
  func.func @transform_6(%arg0: i32) -> (i32, i32) {
    %c0_i32 = arith.constant 0 : i32
    %c0_i32_0 = arith.constant 0 : i32
    %c0_i32_1 = arith.constant 0 : i32
    return %c0_i32, %c0_i32_0 : i32, i32
  }
  func.func @transform_7(%arg0: i32) -> (i32, i32) {
    %c0_i32 = arith.constant 0 : i32
    %c0_i32_0 = arith.constant 0 : i32
    %c0_i32_1 = arith.constant 0 : i32
    return %c0_i32, %c0_i32_0 : i32, i32
  }
  func.func @transform_8(%arg0: i32) -> (i32, i32) {
    %c0_i32 = arith.constant 0 : i32
    %c0_i32_0 = arith.constant 0 : i32
    %c0_i32_1 = arith.constant 0 : i32
    return %c0_i32, %c0_i32_0 : i32, i32
  }
  func.func @transform_9(%arg0: i32) -> (i32, i32) {
    %c0_i32 = arith.constant 0 : i32
    %c0_i32_0 = arith.constant 0 : i32
    return %arg0, %c0_i32 : i32, i32
  }
}

</mosaic_0001>

<bundles_post_ra>
// kernel: tpu_custom_call.1
= control target key start
LH: loop header
LB: loop body
LE: loop exit
PB: predicated region body
PF: predicated region fallthrough
CT: control target
= control target key end

     0   :  { %s1383_s30 = smov 0   ;;  %s1664_s0 = inlined_call_operand.vmem [shape: f32[64,32], index: 0, kind: input, shape index: {}]   ;;  %s1665_s1 = inlined_call_operand.vmem [shape: bf16[128,32], index: 1, kind: input, shape index: {}]   ;;  %s1666_s2 = inlined_call_operand.vmem [shape: f32[1,32], index: 2, kind: input, shape index: {}]   ;;  %s1667_s3 = inlined_call_operand.vmem [shape: f32[1,32], index: 3, kind: input, shape index: {}]   ;;  %s1668_s4 = inlined_call_operand.vmem [shape: f32[1,32], index: 4, kind: input, shape index: {}]   ;;  %s1669_s5 = inlined_call_operand.vmem [shape: bf16[128,32], index: 5, kind: input, shape index: {}]   ;;  %s1670_s6 = inlined_call_operand.vmem [shape: f32[1,32], index: 6, kind: input, shape index: {}]   ;;  %s1671_s7 = inlined_call_operand.vmem [shape: f32[1,32], index: 7, kind: input, shape index: {}]   ;;  %s1672_s8 = inlined_call_operand.vmem [shape: f32[1,32], index: 8, kind: input, shape index: {}]   ;;  %s1673_s9 = inlined_call_operand.vmem [shape: f32[64,32], index: 9, kind: output, shape index: {}]  }
   0x1 LB: > { %s1118_s10 = sadd.s32 4294967295, %s1327_s30   ;;  %p1122_p0 = scmp.ge.s32.totalorder %s1327_s30, 1  ;;  %s1327_s30 = sphi %s1383_s30, %s19_s30  }
   0x2   : > { %p288_p1 = scmp.lt.s32.totalorder %s1327_s30, 3 }
   0x4   : > { %p289_p2 = pnand %p1122_p0, %p288_p1 }
   0x5   : > { %s1123_s11 = sshll.u32 (!%p289_p2), %s1118_s10, 2  ;;  %s1329_s22 = smov (!%p289_p2), 96  }
   0x6   : > { %292 = sbr.rel (%p289_p2) target bundleno = 1108 (0x454), region = 56  ;;  %p325_p3 = scmp.lt.s32.totalorder (!%p289_p2), %s1123_s11, 7 }
   0x7   : > { %s1330_s25 = smov (!%p289_p2), 32   ;;  %s1331_s26 = smov (!%p289_p2), 64  }
   0xb   : > { %v340_v0 = vlaneseq  ;;  %v1200_v1 = vld [vmem:[%s1665_s1 + $0x38] sm:$0xff]  ;;  %v1199_v3 = vld [vmem:[%s1665_s1 + $0x30] sm:$0xff]  ;;  %s1675_s11 = smov (!%p325_p3, %s1123_s11), 7  ;;  %v1198_v5 = vld [vmem:[%s1665_s1 + $0x28] sm:$0xff]  ;;  %vm521_vm6 = vcmask 523264   ;;  %vm516_vm7 = vcmask 261120  }
   0xc   : > { %601 = vmatpush.bf16.msra.mxu0 %v1200_v1  ;;  %1209 = vmatpush.bf16.msra.mxu2 %v1200_v1  ;;  %s1124_s16 = sshll.u32 %s1675_s11, 3  ;;  %v1197_v21 = vld [vmem:[%s1665_s1 + $0x20] sm:$0xff]  ;;  %v1196_v35 = vld [vmem:[%s1665_s1 + $0x18] sm:$0xff]  ;;  %v1195_v36 = vld [vmem:[%s1665_s1 + $0x10] sm:$0xff]  ;;  %vm526_vm8 = vcmask 785408  }
   0xd   : > { %v1394_v2 = vshrl.u32 %v340_v0, 7  ;;  %s328_s19 = scalar_lea.vmem %s1664_s0, %s1124_s16  ;;  %v1194_v37 = vld [vmem:[%s1665_s1 + $0x8] sm:$0xff]  ;;  %v1193_v38 = vld [vmem:[%s1665_s1] sm:$0xff] }
   0xe   : > { %v1413_v6 = vld [vmem:[%s328_s19 + $0x10] sm:$0xff]  ;;  %v1415_v7 = vld [vmem:[%s328_s19 + $0x18] sm:$0xff]  ;;  %v1417_v8 = vld [vmem:[%s328_s19 + $0x8] sm:$0xff] }
   0xf   : > { %v1402_v4 = vand.u32 31, %v1394_v2  ;;  %vm422_vm0 = vcmp.lt.s32.totalorder %v1394_v2, 2  ;;  %v1247_v9 = vpack.i.bf16 %v1415_v7, %v1413_v6  ;;  %v419_v10 = vrot.slane %v1417_v8, 6  ;;  %v1426_v13 = vld [vmem:[%s328_s19] sm:$0xff] }
  0x10   : > { %602 = vmatpush.bf16.msra.mxu0 %v1199_v3  ;;  %1210 = vmatpush.bf16.msra.mxu2 %v1199_v3  ;;  %v420_v11 = vrot.slane %v1413_v6, 6  ;;  %v421_v12 = vrot.slane %v1415_v7, 6  ;;  %v418_v14 = vrot.slane %v1426_v13, 6  ;;  %v444_v15 = vrot.slane %v1417_v8, 7 }
  0x11   : > { %vm427_vm1 = vcmp.lt.s32.totalorder %v1402_v4, 2  ;;  %v445_v16 = vrot.slane %v1413_v6, 7  ;;  %vm452_vm2 = vcmp.lt.s32.totalorder %v1402_v4, 1  ;;  %1248 = vrot.lane.b32.xlu1 %v1247_v9, %s1329_s22  ;;  %v446_v19 = vrot.slane %v1415_v7, 7 }
  0x12   : > { %v423_v17 = vsel %vm422_vm0, %v420_v11, %v421_v12  ;;  %v424_v18 = vsel %vm422_vm0, %v419_v10, %v420_v11  ;;  %v443_v20 = vrot.slane %v1426_v13, 7  ;;  %v425_v23 = vsel %vm422_vm0, %v418_v14, %v419_v10 }
  0x13   : > { %v1237_v22 = vpack.i.bf16 %v423_v17, %v424_v18  ;;  %v426_v24 = vsel %vm422_vm0, %v421_v12, %v418_v14  ;;  %vm447_vm3 = vcmp.lt.s32.totalorder %v1394_v2, 1  ;;  %v1262_v34 = vpack.i.bf16 %v1417_v8, %v1426_v13 }
  0x14   : > { %603 = vmatpush.bf16.msra.mxu0 %v1198_v5  ;;  %1211 = vmatpush.bf16.msra.mxu2 %v1198_v5  ;;  %v439_v25 = vsel %vm427_vm1, 0.0, %v426_v24  ;;  %v450_v26 = vsel %vm447_vm3, %v443_v20, %v444_v15  ;;  %v451_v27 = vsel %vm447_vm3, %v446_v19, %v443_v20  ;;  %v448_v30 = vsel %vm447_vm3, %v445_v16, %v446_v19 }
  0x15   : > { %1238 = vrot.lane.b32.xlu0 %v1237_v22, %s1330_s25  ;;  %v464_v28 = vsel %vm452_vm2, 0.0, %v451_v27  ;;  %v1252_v29 = vpack.i.bf16 %v425_v23, %v439_v25  ;;  %v449_v31 = vsel %vm447_vm3, %v444_v15, %v445_v16  ;;  %v393_v41 = vrot.slane %v1426_v13, 5  ;;  %v1297_v23 = vld [vmem:[%s1666_s2] ss:$0 sm:$0xff] }
  0x16   : > { %v1257_v32 = vpack.i.bf16 %v450_v26, %v464_v28  ;;  %v1242_v33 = vpack.i.bf16 %v448_v30, %v449_v31  ;;  %v396_v42 = vrot.slane %v1415_v7, 5  ;;  %vm397_vm4 = vcmp.lt.s32.totalorder %v1394_v2, 3 }
  0x17   : > { %vm402_vm5 = vcmp.lt.s32.totalorder %v1402_v4, 3  ;;  %v394_v45 = vrot.slane %v1417_v8, 5  ;;  %v395_v47 = vrot.slane %v1413_v6, 5 }
  0x18   : > { %604 = vmatpush.bf16.msra.mxu0 %v1197_v21  ;;  %1212 = vmatpush.bf16.msra.mxu2 %v1197_v21  ;;  %v401_v44 = vsel %vm397_vm4, %v396_v42, %v393_v41 }
  0x19   : > { %1258 = vrot.lane.b32.xlu2 %v1257_v32, %s1331_s26  ;;  %1253 = vrot.lane.b32.xlu1 %v1252_v29, %s1330_s25  ;;  %v400_v48 = vsel %vm397_vm4, %v393_v41, %v394_v45  ;;  %v414_v49 = vsel %vm402_vm5, 0.0, %v401_v44  ;;  %v398_v59 = vsel %vm397_vm4, %v395_v47, %v396_v42  ;;  %v399_v60 = vsel %vm397_vm4, %v394_v45, %v395_v47 }
  0x1a   : > { %vm739_vm5 = vcmp.lt.s32.totalorder %v1394_v2, 6 }
  0x1c   : > { %605 = vmatpush.bf16.msra.mxu0 %v1196_v35  ;;  %1213 = vmatpush.bf16.msra.mxu2 %v1196_v35  ;;  %v1332_v35 = vmov 32.0  }
  0x1d   : > { %1243 = vrot.lane.b32.xlu0 %v1242_v33, %s1331_s26  ;;  %1303 = vrcp.f32 %v1332_v35 }
  0x20   : > { %606 = vmatpush.bf16.msra.mxu0 %v1195_v36  ;;  %1214 = vmatpush.bf16.msra.mxu2 %v1195_v36 }
  0x21   : > { %1263 = vrot.lane.b32.xlu2 %v1262_v34, %s1329_s22 }
  0x23   : > { %v1304_v36 = vpop.eup %1303 }
  0x24   : > { %607 = vmatpush.bf16.msra.mxu0 %v1194_v37  ;;  %1215 = vmatpush.bf16.msra.mxu2 %v1194_v37  ;;  %v633_v37 = vmul.f32 32.0, %v1304_v36  ;;  %vm637_vm9 = vweird.f32 %v1304_v36 }
  0x28   : > { %608 = vmatpush.bf16.msra.mxu0 %v1193_v38  ;;  %1216 = vmatpush.bf16.msra.mxu2 %v1193_v38  ;;  %v634_v38 = vsub.f32 1.0, %v633_v37 }
  0x73   : > { %v1259_v39 = vpop.permute.xlu2 %1258 }
  0x74   : > { %v1261_v50 = vunpack.i.h.bf16 %v1259_v39  ;;  %v1260_v51 = vunpack.i.l.bf16 %v1259_v39  ;;  %v635_v39 = vmul.f32 %v1304_v36, %v634_v38 }
  0x7b   : > { %v1264_v46 = vpop.permute.xlu2 %1263 }
  0x7c   : > { %v1266_v53 = vunpack.i.h.bf16 %v1264_v46  ;;  %v1265_v54 = vunpack.i.l.bf16 %v1264_v46 }
  0x83   : > { %v1249_v40 = vpop.permute.xlu1 %1248 }
  0x84   : > { %v1251_v61 = vunpack.i.h.bf16 %v1249_v40  ;;  %v1250_v62 = vunpack.i.l.bf16 %v1249_v40  ;;  %v636_v40 = vadd.f32 %v1304_v36, %v635_v39 }
  0x86   : > { %v1503_v41 = vsel %vm637_vm9, %v1304_v36, %v636_v40 }
  0x87   : > { %v1239_v43 = vpop.permute.xlu0 %1238 }
  0x88   : > { %v1241_v55 = vunpack.i.h.bf16 %v1239_v43  ;;  %v1240_v56 = vunpack.i.l.bf16 %v1239_v43 }
  0x8a   : > { %v520_v11 = vsel %vm516_vm7, %v398_v59, %v1241_v55  ;;  %v519_v12 = vsel %vm516_vm7, %v399_v60, %v1240_v56 }
  0x8b   : > { %v1254_v52 = vpop.permute.xlu1 %1253 }
  0x8c   : > { %v1256_v57 = vunpack.i.h.bf16 %v1254_v52  ;;  %v1255_v58 = vunpack.i.l.bf16 %v1254_v52 }
  0x8e   : > { %v517_v63 = vsel %vm516_vm7, %v414_v49, %v1255_v58  ;;  %v518_v0 = vsel %vm516_vm7, %v400_v48, %v1256_v57 }
  0x8f   : > { %v1244_v1 = vpop.permute.xlu0 %1243  ;;  %v522_v9 = vsel %vm521_vm6, %v517_v63, %v1260_v51  ;;  %v523_v10 = vsel %vm521_vm6, %v518_v0, %v1261_v50 }
  0x90   : > { %v1246_v3 = vunpack.i.h.bf16 %v1244_v1  ;;  %v1245_v5 = vunpack.i.l.bf16 %v1244_v1  ;;  %v527_v14 = vsel %vm526_vm8, %v522_v9, %v1265_v54  ;;  %v528_v15 = vsel %vm526_vm8, %v523_v10, %v1266_v53 }
  0x91   : > { %v531_v16 = vpack.c.bf16 %v528_v15, %v527_v14 }
  0x92   : > { %v524_v17 = vsel %vm521_vm6, %v519_v12, %v1245_v5  ;;  %v525_v18 = vsel %vm521_vm6, %v520_v11, %v1246_v3 }
  0x93   : > { %v529_v19 = vsel %vm526_vm8, %v524_v17, %v1250_v62  ;;  %v530_v20 = vsel %vm526_vm8, %v525_v18, %v1251_v61  ;;  %609 = vmatmul.bf16.vlgmr.msra.gmra.mxu0 %v531_v16 }
  0x94   : > { %v532_v21 = vpack.c.bf16 %v530_v20, %v529_v19 }
  0x96   : > { %614 = vmatmul.bf16.vlgmr.msra.gmra.mxu2 %v532_v21 }
 0x110   : > { %v610_v22 = vpop.f32.mrf.mxu0 }
 0x111   : > { %v611_v33 = vadd.f32 %v1297_v23, %v610_v22 }
 0x113   : > { %v620_v34 = vsel %vm516_vm7, %v611_v33, 0.0 }
 0x118   : > { %v612_v24 = vpop.f32.mrf.mxu0 }
 0x119   : > { %v615_v25 = vpop.f32.mrf.mxu2  ;;  %v613_v26 = vadd.f32 %v1297_v23, %v612_v24 }
 0x11a   : > { %v616_v27 = vadd.f32 %v1297_v23, %v615_v25 }
 0x11b   : > { %v623_v29 = vsel %vm516_vm7, %v613_v26, 0.0 }
 0x11c   : > { %v626_v28 = vsel %vm516_vm7, %v616_v27, 0.0  ;;  %624 = vadd.xlane.f32.xlu0 %v623_v29  ;;  %v1298_v29 = vld [vmem:[%s1667_s3] ss:$0 sm:$0xff] }
 0x11d   : > { %627 = vadd.xlane.f32.xlu1 %v626_v28 }
 0x121   : > { %v617_v30 = vpop.f32.mrf.mxu2 }
 0x122   : > { %v618_v31 = vadd.f32 %v1297_v23, %v617_v30 }
 0x124   : > { %v629_v32 = vsel %vm516_vm7, %v618_v31, 0.0 }
 0x125   : > { %630 = vadd.xlane.f32.xlu2 %v629_v32 }
 0x12d   : > { %621 = vadd.xlane.f32.xlu2 %v620_v34  ;;  %v1299_v34 = vld [vmem:[%s1668_s4] ss:$0 sm:$0xff] }
 0x18f   : > { %v625_v43 = vpop.xlane.xlu0 %624 }
 0x190   : > { %v628_v42 = vpop.xlane.xlu1 %627  ;;  %v640_v45 = vmul.f32 %v1503_v41, %v625_v43 }
 0x191   : > { %v641_v44 = vmul.f32 %v1503_v41, %v628_v42 }
 0x192   : > { %v644_v47 = vsub.f32 %v613_v26, %v640_v45 }
 0x193   : > { %v645_v46 = vsub.f32 %v616_v27, %v641_v44 }
 0x194   : > { %v648_v49 = vmul.f32 %v644_v47, %v644_v47 }
 0x195   : > { %v649_v48 = vmul.f32 %v645_v46, %v645_v46 }
 0x196   : > { %v654_v51 = vsel %vm516_vm7, %v648_v49, 0.0 }
 0x197   : > { %v657_v50 = vsel %vm516_vm7, %v649_v48, 0.0  ;;  %655 = vadd.xlane.f32.xlu0 %v654_v51 }
 0x198   : > { %v631_v52 = vpop.xlane.xlu2 %630  ;;  %658 = vadd.xlane.f32.xlu1 %v657_v50 }
 0x199   : > { %v642_v53 = vmul.f32 %v1503_v41, %v631_v52 }
 0x19b   : > { %v1510_v54 = vsub.f32 %v618_v31, %v642_v53 }
 0x19d   : > { %v650_v55 = vmul.f32 %v1510_v54, %v1510_v54 }
 0x19f   : > { %v660_v56 = vsel %vm516_vm7, %v650_v55, 0.0 }
 0x1a0   : > { %661 = vadd.xlane.f32.xlu2 %v660_v56  ;;  %v622_v57 = vpop.xlane.xlu2 %621 }
 0x1a1   : > { %v639_v58 = vmul.f32 %v1503_v41, %v622_v57 }
 0x1a3   : > { %v1516_v59 = vsub.f32 %v611_v33, %v639_v58 }
 0x1a5   : > { %v647_v60 = vmul.f32 %v1516_v59, %v1516_v59 }
 0x1a7   : > { %v651_v61 = vsel %vm516_vm7, %v647_v60, 0.0 }
 0x1a8   : > { %652 = vadd.xlane.f32.xlu0 %v651_v61 }
 0x20a   : > { %v656_v63 = vpop.xlane.xlu0 %655 }
 0x20b   : > { %v659_v62 = vpop.xlane.xlu1 %658  ;;  %v664_v1 = vmul.f32 %v656_v63, %v1503_v41 }
 0x20c   : > { %v665_v0 = vmul.f32 %v659_v62, %v1503_v41 }
 0x20d   : > { %v668_v5 = vadd.f32 1e-08, %v664_v1 }
 0x20e   : > { %v669_v3 = vadd.f32 1e-08, %v665_v0 }
 0x20f   : > { %vm687_vm14 = vweird.f32 %v668_v5 }
 0x210   : > { %1305 = vrsqrt.f32 %v669_v3  ;;  %vm697_vm12 = vweird.f32 %v669_v3 }
 0x211   : > { %1307 = vrsqrt.f32 %v668_v5 }
 0x213   : > { %v662_v9 = vpop.xlane.xlu2 %661 }
 0x214   : > { %v666_v10 = vmul.f32 %v662_v9, %v1503_v41 }
 0x216   : > { %v1306_v11 = vpop.eup %1305  ;;  %v670_v12 = vadd.f32 1e-08, %v666_v10 }
 0x217   : > { %v1308_v14 = vpop.eup %1307  ;;  %v692_v15 = vmul.f32 %v1306_v11, %v669_v3  ;;  %vm698_vm10 = vweird.f32 %v1306_v11 }
 0x218   : > { %v682_v16 = vmul.f32 %v1308_v14, %v668_v5  ;;  %1309 = vrsqrt.f32 %v670_v12  ;;  %vm688_vm11 = vweird.f32 %v1308_v14  ;;  %vm699_vm13 = vmor %vm697_vm12, %vm698_vm10  ;;  %vm707_vm3 = vweird.f32 %v670_v12 }
 0x219   : > { %v693_v17 = vmul.f32 %v1306_v11, %v692_v15  ;;  %vm689_vm15 = vmor %vm687_vm14, %vm688_vm11  ;;  %vm764_vm12 = vcmp.lt.s32.totalorder %v1394_v2, 4  ;;  %v1206_v2 = vld [vmem:[%s1669_s5 + $0x28] sm:$0xff] }
 0x21a   : > { %v683_v18 = vmul.f32 %v1308_v14, %v682_v16 }
 0x21b   : > { %v694_v19 = vmul.f32 0.5, %v693_v17  ;;  %v653_v20 = vpop.xlane.xlu0 %652 }
 0x21c   : > { %v684_v21 = vmul.f32 0.5, %v683_v18  ;;  %v663_v22 = vmul.f32 %v653_v20, %v1503_v41 }
 0x21d   : > { %v695_v23 = vsub.f32 1.5, %v694_v19 }
 0x21e   : > { %v1310_v24 = vpop.eup %1309  ;;  %v685_v25 = vsub.f32 1.5, %v684_v21  ;;  %v667_v26 = vadd.f32 1e-08, %v663_v22 }
 0x21f   : > { %v696_v27 = vmul.f32 %v1306_v11, %v695_v23  ;;  %v702_v28 = vmul.f32 %v1310_v24, %v670_v12  ;;  %vm708_vm2 = vweird.f32 %v1310_v24 }
 0x220   : > { %v686_v30 = vmul.f32 %v1308_v14, %v685_v25  ;;  %1311 = vrsqrt.f32 %v667_v26  ;;  %vm709_vm4 = vmor %vm707_vm3, %vm708_vm2  ;;  %vm677_vm10 = vweird.f32 %v667_v26 }
 0x221   : > { %v700_v31 = vsel %vm699_vm13, %v1306_v11, %v696_v27  ;;  %v703_v32 = vmul.f32 %v1310_v24, %v702_v28  ;;  %vm769_vm13 = vcmp.lt.s32.totalorder %v1402_v4, 4 }
 0x222   : > { %v713_v33 = vmul.f32 %v700_v31, %v645_v46  ;;  %v690_v35 = vsel %vm689_vm15, %v1308_v14, %v686_v30 }
 0x223   : > { %v712_v36 = vmul.f32 %v690_v35, %v644_v47  ;;  %v704_v37 = vmul.f32 0.5, %v703_v32 }
 0x224   : > { %v721_v38 = vmul.f32 %v1298_v29, %v713_v33 }
 0x225   : > { %v720_v39 = vmul.f32 %v1298_v29, %v712_v36  ;;  %v705_v40 = vsub.f32 1.5, %v704_v37  ;;  %v1208_v37 = vld [vmem:[%s1669_s5 + $0x38] sm:$0xff] }
 0x226   : > { %v1312_v42 = vpop.eup %1311  ;;  %v729_v43 = vadd.f32 %v1299_v34, %v721_v38  ;;  %1217 = vmatpush.bf16.msra.mxu3 %v1208_v37  ;;  %v1207_v38 = vld [vmem:[%s1669_s5 + $0x30] sm:$0xff]  ;;  %927 = vmatpush.bf16.msra.mxu1 %v1208_v37 }
 0x227   : > { %v728_v44 = vadd.f32 %v1299_v34, %v720_v39  ;;  %v706_v45 = vmul.f32 %v1310_v24, %v705_v40  ;;  %v672_v48 = vmul.f32 %v1312_v42, %v667_v26  ;;  %vm678_vm9 = vweird.f32 %v1312_v42  ;;  %v1205_v39 = vld [vmem:[%s1669_s5 + $0x20] sm:$0xff]  ;;  %v1204_v40 = vld [vmem:[%s1669_s5 + $0x18] sm:$0xff] }
 0x228   : > { %v733_v49 = vmax.f32 %v729_v43, 0.0  ;;  %vm679_vm11 = vmor %vm677_vm10, %vm678_vm9  ;;  %v1202_v43 = vld [vmem:[%s1669_s5 + $0x8] sm:$0xff] }
 0x229   : > { %v732_v46 = vmax.f32 %v728_v44, 0.0  ;;  %v710_v50 = vsel %vm709_vm4, %v1310_v24, %v706_v45  ;;  %v673_v51 = vmul.f32 %v1312_v42, %v672_v48  ;;  %v1201_v44 = vld [vmem:[%s1669_s5] sm:$0xff] }
 0x22a   : > { %v714_v52 = vmul.f32 %v710_v50, %v1510_v54  ;;  %v737_v53 = vrot.slane %v733_v49, 2  ;;  %v787_v63 = vrot.slane %v733_v49, 6  ;;  %v762_v1 = vrot.slane %v733_v49, 4  ;;  %1218 = vmatpush.bf16.msra.mxu3 %v1207_v38  ;;  %928 = vmatpush.bf16.msra.mxu1 %v1207_v38 }
 0x22b   : > { %v674_v47 = vmul.f32 0.5, %v673_v51  ;;  %v736_v55 = vrot.slane %v732_v46, 2  ;;  %v786_v62 = vrot.slane %v732_v46, 6  ;;  %v761_v54 = vrot.slane %v732_v46, 4 }
 0x22c   : > { %v722_v56 = vmul.f32 %v1298_v29, %v714_v52 }
 0x22d   : > { %v675_v57 = vsub.f32 1.5, %v674_v47  ;;  %v1535_v58 = vsel %vm739_vm5, %v736_v55, %v737_v53  ;;  %v790_v12 = vsel %vm422_vm0, %v786_v62, %v787_v63  ;;  %v766_v18 = vsel %vm764_vm12, %v761_v54, %v762_v1 }
 0x22e   : > { %v730_v60 = vadd.f32 %v1299_v34, %v722_v56  ;;  %1219 = vmatpush.bf16.msra.mxu3 %v1206_v2  ;;  %929 = vmatpush.bf16.msra.mxu1 %v1206_v2 }
 0x22f   : > { %v676_v61 = vmul.f32 %v1312_v42, %v675_v57 }
 0x230   : > { %v734_v0 = vmax.f32 %v730_v60, 0.0 }
 0x231   : > { %v680_v3 = vsel %vm679_vm11, %v1312_v42, %v676_v61  ;;  %v1203_v42 = vld [vmem:[%s1669_s5 + $0x10] sm:$0xff] }
 0x232   : > { %v711_v5 = vmul.f32 %v680_v3, %v1516_v59  ;;  %v1267_v9 = vpack.i.bf16 %v734_v0, %v733_v49  ;;  %v788_v10 = vrot.slane %v734_v0, 6  ;;  %v763_v11 = vrot.slane %v734_v0, 4  ;;  %1220 = vmatpush.bf16.msra.mxu3 %v1205_v39  ;;  %930 = vmatpush.bf16.msra.mxu1 %v1205_v39 }
 0x233   : > { %v738_v14 = vrot.slane %v734_v0, 2 }
 0x234   : > { %v719_v15 = vmul.f32 %v1298_v29, %v711_v5  ;;  %1268 = vrot.lane.b32.xlu0 %v1267_v9, %s1329_s22  ;;  %v789_v16 = vsel %vm422_vm0, %v787_v63, %v788_v10  ;;  %v765_v17 = vsel %vm764_vm12, %v762_v1, %v763_v11 }
 0x235   : > { %v1277_v59 = vpack.i.bf16 %v789_v16, %v790_v12  ;;  %v1272_v19 = vpack.i.bf16 %v765_v17, %v766_v18  ;;  %v740_v20 = vsel %vm739_vm5, %v737_v53, %v738_v14 }
 0x236   : > { %v727_v21 = vadd.f32 %v1299_v34, %v719_v15  ;;  %1221 = vmatpush.bf16.msra.mxu3 %v1204_v40  ;;  %931 = vmatpush.bf16.msra.mxu1 %v1204_v40 }
 0x237   : > { %1278 = vrot.lane.b32.xlu2 %v1277_v59, %s1331_s26  ;;  %1273 = vrot.lane.b32.xlu1 %v1272_v19, %s1330_s25  ;;  %v1300_v19 = vld [vmem:[%s1670_s6] ss:$0 sm:$0xff] }
 0x238   : > { %v731_v22 = vmax.f32 %v727_v21, 0.0 }
 0x23a   : > { %v785_v23 = vrot.slane %v731_v22, 6  ;;  %v760_v24 = vrot.slane %v731_v22, 4  ;;  %v735_v25 = vrot.slane %v731_v22, 2  ;;  %v1292_v26 = vpack.i.bf16 %v732_v46, %v731_v22  ;;  %1222 = vmatpush.bf16.msra.mxu3 %v1203_v42  ;;  %932 = vmatpush.bf16.msra.mxu1 %v1203_v42 }
 0x23c   : > { %v791_v27 = vsel %vm422_vm0, %v785_v23, %v786_v62  ;;  %v792_v28 = vsel %vm422_vm0, %v788_v10, %v785_v23  ;;  %v767_v29 = vsel %vm764_vm12, %v760_v24, %v761_v54  ;;  %v768_v30 = vsel %vm764_vm12, %v763_v11, %v760_v24 }
 0x23d   : > { %v793_v31 = vsel %vm427_vm1, 0.0, %v792_v28  ;;  %v781_v32 = vsel %vm769_vm13, 0.0, %v768_v30  ;;  %v742_v33 = vsel %vm739_vm5, %v735_v25, %v736_v55  ;;  %v743_v34 = vsel %vm739_vm5, %v738_v14, %v735_v25 }
 0x23e   : > { %v1287_v35 = vpack.i.bf16 %v791_v27, %v793_v31  ;;  %v1282_v36 = vpack.i.bf16 %v767_v29, %v781_v32  ;;  %1223 = vmatpush.bf16.msra.mxu3 %v1202_v43  ;;  %933 = vmatpush.bf16.msra.mxu1 %v1202_v43  ;;  %vm744_vm0 = vcmp.lt.s32.totalorder %v1402_v4, 6 }
 0x23f   : > { %1293 = vrot.lane.b32.xlu2 %v1292_v26, %s1329_s22  ;;  %v756_v10 = vsel %vm744_vm0, 0.0, %v743_v34  ;;  %s334_s22 = scalar_lea.vmem %s1673_s9, %s1124_s16 }
 0x240   : > { %1288 = vrot.lane.b32.xlu0 %v1287_v35, %s1331_s26  ;;  %1283 = vrot.lane.b32.xlu1 %v1282_v36, %s1330_s25 }
 0x242   : > { %1224 = vmatpush.bf16.msra.mxu3 %v1201_v44  ;;  %934 = vmatpush.bf16.msra.mxu1 %v1201_v44 }
 0x291   : > { %v1279_v45 = vpop.permute.xlu2 %1278 }
 0x292   : > { %v1281_v51 = vunpack.i.h.bf16 %v1279_v45  ;;  %v1280_v52 = vunpack.i.l.bf16 %v1279_v45 }
 0x299   : > { %v1294_v0 = vpop.permute.xlu2 %1293 }
 0x29a   : > { %v1296_v11 = vunpack.i.h.bf16 %v1294_v0  ;;  %v1295_v12 = vunpack.i.l.bf16 %v1294_v0 }
 0x2a6   : > { %v1269_v48 = vpop.permute.xlu0 %1268 }
 0x2a7   : > { %v1271_v53 = vunpack.i.h.bf16 %v1269_v48  ;;  %v1270_v47 = vunpack.i.l.bf16 %v1269_v48 }
 0x2a9   : > { %v1274_v49 = vpop.permute.xlu1 %1273 }
 0x2aa   : > { %v1276_v46 = vunpack.i.h.bf16 %v1274_v49  ;;  %v1275_v50 = vunpack.i.l.bf16 %v1274_v49 }
 0x2ac   : > { %v847_v55 = vsel %vm516_vm7, %v1535_v58, %v1275_v50  ;;  %v848_v56 = vsel %vm516_vm7, %v740_v20, %v1276_v46 }
 0x2ad   : > { %v851_v57 = vsel %vm521_vm6, %v847_v55, %v1280_v52  ;;  %v852_v60 = vsel %vm521_vm6, %v848_v56, %v1281_v51 }
 0x2ae   : > { %v855_v61 = vsel %vm526_vm8, %v851_v57, %v1270_v47  ;;  %v856_v62 = vsel %vm526_vm8, %v852_v60, %v1271_v53 }
 0x2af   : > { %v858_v63 = vpack.c.bf16 %v856_v62, %v855_v61 }
 0x2b1   : > { %940 = vmatmul.bf16.vlgmr.msra.gmra.mxu3 %v858_v63 }
 0x2b2   : > { %v1289_v54 = vpop.permute.xlu0 %1288  ;;  %v1284_v1 = vpop.permute.xlu1 %1283 }
 0x2b3   : > { %v1291_v3 = vunpack.i.h.bf16 %v1289_v54  ;;  %v1290_v5 = vunpack.i.l.bf16 %v1289_v54  ;;  %v1286_v58 = vunpack.i.h.bf16 %v1284_v1  ;;  %v1285_v9 = vunpack.i.l.bf16 %v1284_v1 }
 0x2b5   : > { %v846_v14 = vsel %vm516_vm7, %v742_v33, %v1286_v58  ;;  %v845_v15 = vsel %vm516_vm7, %v756_v10, %v1285_v9 }
 0x2b6   : > { %v849_v16 = vsel %vm521_vm6, %v845_v15, %v1290_v5  ;;  %v850_v17 = vsel %vm521_vm6, %v846_v14, %v1291_v3 }
 0x2b7   : > { %v853_v18 = vsel %vm526_vm8, %v849_v16, %v1295_v12  ;;  %v854_v4 = vsel %vm526_vm8, %v850_v17, %v1296_v11 }
 0x2b8   : > { %v857_v59 = vpack.c.bf16 %v854_v4, %v853_v18 }
 0x2ba   : > { %935 = vmatmul.bf16.vlgmr.msra.gmra.mxu1 %v857_v59 }
 0x334   : > { %v941_v20 = vpop.f32.mrf.mxu3 }
 0x335   : > { %v942_v21 = vadd.f32 %v1300_v19, %v941_v20 }
 0x337   : > { %v936_v22 = vpop.f32.mrf.mxu1  ;;  %v952_v23 = vsel %vm516_vm7, %v942_v21, 0.0 }
 0x338   : > { %v937_v24 = vadd.f32 %v1300_v19, %v936_v22  ;;  %953 = vadd.xlane.f32.xlu2 %v952_v23  ;;  %v1301_v23 = vld [vmem:[%s1671_s7] ss:$0 sm:$0xff] }
 0x33a   : > { %v946_v25 = vsel %vm516_vm7, %v937_v24, 0.0 }
 0x33b   : > { %947 = vadd.xlane.f32.xlu1 %v946_v25 }
 0x33c   : > { %v943_v26 = vpop.f32.mrf.mxu3 }
 0x33d   : > { %v944_v27 = vadd.f32 %v1300_v19, %v943_v26 }
 0x33f   : > { %v938_v28 = vpop.f32.mrf.mxu1  ;;  %v955_v31 = vsel %vm516_vm7, %v944_v27, 0.0 }
 0x340   : > { %v939_v29 = vadd.f32 %v1300_v19, %v938_v28 }
 0x342   : > { %v949_v30 = vsel %vm516_vm7, %v939_v29, 0.0 }
 0x343   : > { %950 = vadd.xlane.f32.xlu0 %v949_v30  ;;  %956 = vadd.xlane.f32.xlu1 %v955_v31 }
 0x3ab   : > { %v954_v32 = vpop.xlane.xlu2 %953 }
 0x3ac   : > { %v960_v33 = vmul.f32 %v954_v32, %v1503_v41 }
 0x3ae   : > { %v1616_v34 = vsub.f32 %v942_v21, %v960_v33  ;;  %v948_v35 = vpop.xlane.xlu1 %947 }
 0x3af   : > { %v958_v36 = vmul.f32 %v948_v35, %v1503_v41 }
 0x3b0   : > { %v968_v37 = vmul.f32 %v1616_v34, %v1616_v34 }
 0x3b1   : > { %v962_v38 = vsub.f32 %v937_v24, %v958_v36 }
 0x3b2   : > { %v976_v2 = vsel %vm516_vm7, %v968_v37, 0.0 }
 0x3b3   : > { %977 = vadd.xlane.f32.xlu1 %v976_v2  ;;  %v966_v39 = vmul.f32 %v962_v38, %v962_v38 }
 0x3b5   : > { %v970_v40 = vsel %vm516_vm7, %v966_v39, 0.0 }
 0x3b6   : > { %v951_v42 = vpop.xlane.xlu0 %950  ;;  %971 = vadd.xlane.f32.xlu0 %v970_v40  ;;  %v957_v43 = vpop.xlane.xlu1 %956 }
 0x3b7   : > { %v959_v44 = vmul.f32 %v951_v42, %v1503_v41  ;;  %v961_v45 = vmul.f32 %v957_v43, %v1503_v41 }
 0x3b9   : > { %v1625_v48 = vsub.f32 %v939_v29, %v959_v44  ;;  %v1627_v49 = vsub.f32 %v944_v27, %v961_v45  ;;  %v1302_v27 = vld [vmem:[%s1672_s8] ss:$0 sm:$0xff] }
 0x3bb   : > { %v969_v46 = vmul.f32 %v1627_v49, %v1627_v49  ;;  %v967_v50 = vmul.f32 %v1625_v48, %v1625_v48 }
 0x3bd   : > { %v979_v51 = vsel %vm516_vm7, %v969_v46, 0.0  ;;  %v973_v52 = vsel %vm516_vm7, %v967_v50, 0.0 }
 0x3be   : > { %980 = vadd.xlane.f32.xlu0 %v979_v51  ;;  %974 = vadd.xlane.f32.xlu2 %v973_v52 }
 0x426   : > { %v978_v53 = vpop.xlane.xlu1 %977 }
 0x427   : > { %v984_v47 = vmul.f32 %v978_v53, %v1503_v41 }
 0x429   : > { %v988_v55 = vadd.f32 1e-08, %v984_v47  ;;  %v972_v56 = vpop.xlane.xlu0 %971 }
 0x42a   : > { %v982_v57 = vmul.f32 %v972_v56, %v1503_v41 }
 0x42b   : > { %1313 = vrsqrt.f32 %v988_v55  ;;  %vm1016_vm8 = vweird.f32 %v988_v55 }
 0x42c   : > { %v986_v60 = vadd.f32 1e-08, %v982_v57 }
 0x42e   : > { %1315 = vrsqrt.f32 %v986_v60  ;;  %vm996_vm15 = vweird.f32 %v986_v60 }
 0x431   : > { %v1314_v61 = vpop.eup %1313  ;;  %v981_v62 = vpop.xlane.xlu0 %980 }
 0x432   : > { %v975_v63 = vpop.xlane.xlu2 %974  ;;  %v1011_v0 = vmul.f32 %v1314_v61, %v988_v55  ;;  %v985_v54 = vmul.f32 %v981_v62, %v1503_v41  ;;  %vm1017_vm1 = vweird.f32 %v1314_v61 }
 0x433   : > { %v983_v1 = vmul.f32 %v975_v63, %v1503_v41  ;;  %vm1018_vm14 = vmor %vm1016_vm8, %vm1017_vm1 }
 0x434   : > { %v1316_v3 = vpop.eup %1315  ;;  %v1012_v5 = vmul.f32 %v1314_v61, %v1011_v0  ;;  %v989_v58 = vadd.f32 1e-08, %v985_v54 }
 0x435   : > { %v987_v9 = vadd.f32 1e-08, %v983_v1  ;;  %v991_v10 = vmul.f32 %v1316_v3, %v986_v60  ;;  %vm997_vm6 = vweird.f32 %v1316_v3 }
 0x436   : > { %v1013_v11 = vmul.f32 0.5, %v1012_v5  ;;  %1317 = vrsqrt.f32 %v989_v58  ;;  %vm998_vm2 = vmor %vm996_vm15, %vm997_vm6  ;;  %vm1026_vm5 = vweird.f32 %v989_v58 }
 0x437   : > { %v992_v12 = vmul.f32 %v1316_v3, %v991_v10  ;;  %1319 = vrsqrt.f32 %v987_v9  ;;  %vm1006_vm10 = vweird.f32 %v987_v9 }
 0x438   : > { %v1014_v14 = vsub.f32 1.5, %v1013_v11 }
 0x439   : > { %v993_v15 = vmul.f32 0.5, %v992_v12 }
 0x43a   : > { %v1015_v16 = vmul.f32 %v1314_v61, %v1014_v14 }
 0x43b   : > { %v994_v17 = vsub.f32 1.5, %v993_v15 }
 0x43c   : > { %v1318_v18 = vpop.eup %1317  ;;  %v1019_v20 = vsel %vm1018_vm14, %v1314_v61, %v1015_v16 }
 0x43d   : > { %v1320_v4 = vpop.eup %1319  ;;  %v995_v41 = vmul.f32 %v1316_v3, %v994_v17  ;;  %v1021_v59 = vmul.f32 %v1318_v18, %v989_v58  ;;  %v1032_v28 = vmul.f32 %v1019_v20, %v1616_v34  ;;  %vm1027_vm3 = vweird.f32 %v1318_v18 }
 0x43e   : > { %v1001_v19 = vmul.f32 %v1320_v4, %v987_v9  ;;  %vm1007_vm4 = vweird.f32 %v1320_v4  ;;  %vm1028_vm9 = vmor %vm1026_vm5, %vm1027_vm3 }
 0x43f   : > { %v999_v21 = vsel %vm998_vm2, %v1316_v3, %v995_v41  ;;  %v1022_v22 = vmul.f32 %v1318_v18, %v1021_v59  ;;  %v1040_v36 = vmul.f32 %v1301_v23, %v1032_v28  ;;  %vm1008_vm11 = vmor %vm1006_vm10, %vm1007_vm4 }
 0x440   : > { %v1030_v24 = vmul.f32 %v999_v21, %v962_v38  ;;  %v1002_v25 = vmul.f32 %v1320_v4, %v1001_v19 }
 0x441   : > { %v1023_v26 = vmul.f32 0.5, %v1022_v22  ;;  %v1048_v43 = vadd.f32 %v1302_v27, %v1040_v36 }
 0x442   : > { %v1038_v29 = vmul.f32 %v1301_v23, %v1030_v24  ;;  %v1003_v30 = vmul.f32 0.5, %v1002_v25 }
 0x443   : > { %v1024_v31 = vsub.f32 1.5, %v1023_v26  ;;  %v1052_v51 = vmax.f32 %v1048_v43, 0.0 }
 0x444   : > { %v1046_v32 = vadd.f32 %v1302_v27, %v1038_v29  ;;  %v1004_v33 = vsub.f32 1.5, %v1003_v30 }
 0x445   : > { %v1025_v35 = vmul.f32 %v1318_v18, %v1024_v31  ;;  %v1056_v55 = vadd.f32 %v1052_v51, %v1413_v6 }
 0x446   : > { %v1050_v37 = vmax.f32 %v1046_v32, 0.0  ;;  %v1005_v38 = vmul.f32 %v1320_v4, %v1004_v33 }
 0x447   : > { %v1029_v34 = vsel %vm1028_vm9, %v1318_v18, %v1025_v35  ;;  %1060 = vst.msk [vmem:[%s334_s22 + $0x10] sm:$0xff] %vm516_vm7, %v1056_v55 }
 0x448   : > { %v1054_v2 = vadd.f32 %v1050_v37, %v1426_v13  ;;  %v1033_v39 = vmul.f32 %v1029_v34, %v1627_v49  ;;  %v1009_v40 = vsel %vm1008_vm11, %v1320_v4, %v1005_v38 }
 0x449   : > { %v1031_v42 = vmul.f32 %v1009_v40, %v1625_v48 }
 0x44a   : > { %1058 = vst.msk [vmem:[%s334_s22] sm:$0xff] %vm516_vm7, %v1054_v2  ;;  %v1041_v44 = vmul.f32 %v1301_v23, %v1033_v39 }
 0x44b   : > { %v1039_v45 = vmul.f32 %v1301_v23, %v1031_v42 }
 0x44c   : > { %v1049_v46 = vadd.f32 %v1302_v27, %v1041_v44 }
 0x44d   : > { %v1047_v50 = vadd.f32 %v1302_v27, %v1039_v45 }
 0x44e   : > { %v1053_v52 = vmax.f32 %v1049_v46, 0.0 }
 0x44f   : > { %v1051_v53 = vmax.f32 %v1047_v50, 0.0 }
 0x450   : > { %v1057_v13 = vadd.f32 %v1053_v52, %v1415_v7 }
 0x451   : > { %v1055_v47 = vadd.f32 %v1051_v53, %v1417_v8 }
 0x452   : > { %1061 = vst.msk [vmem:[%s334_s22 + $0x18] sm:$0xff] %vm516_vm7, %v1057_v13 }
 0x453   : > { %1059 = vst.msk [vmem:[%s334_s22 + $0x8] sm:$0xff] %vm516_vm7, %v1055_v47 }
 0x454 PF: > { %s19_s30 = sadd.s32 1, %s1327_s30  }
 0x455   : > { %p16_p4 = scmp.ge.s32.totalorder %s19_s30, 4  }
 0x457   :  { %18 = sbr.rel (!%p16_p4) target bundleno = 1 (0x1), region = 86 }

</bundles_post_ra>
